<compile_context>
chip_gen: v7x
topology: tpu7x:2x2x1
jax: 0.10.0
libtpu: 0.0.40
codegen_flags: <defaults>
</compile_context>

<pallas_src>
import functools
import math

import jax
import jax.numpy as jnp
from jax.experimental import pallas as pl
from jax.experimental.pallas import tpu as pltpu

_LOG_EPS = math.log(1e-10)  # clamp matching torch's log(softmax + 1e-10)


def _round_up(x, m):
    return ((x + m - 1) // m) * m


def _vmem_budget_and_limit():
    # v5e/v6e: 128 MiB physical VMEM, v7x: 64 MiB.  Raise the scoped limit
    # explicitly (defaults 16/32/32 MiB) and size the input-window budget with
    # headroom for compiler scratch / temporaries.
    phys = 128 * 1024 * 1024
    try:
        phys = int(pltpu.get_tpu_info().vmem_capacity_bytes)
    except Exception:
        pass
    if phys <= 64 * 1024 * 1024:                     # v7x
        return 20 * 1024 * 1024, 40 * 1024 * 1024
    return 32 * 1024 * 1024, 64 * 1024 * 1024        # v5e / v6e


def _pick_b_tile(C, D, logit_itemsize, feat_itemsize, budget):
    # Lane-padded per-row bytes of one pipelined buffer of the input windows
    # (narrow blocks pad to 128 lanes in VMEM; the side slab is always 128*4).
    pC = _round_up(C, 128)
    pD = _round_up(D, 128)
    in_row = pC * logit_itemsize + pD * feat_itemsize + 128 * 4
    # In-kernel f32 temporaries: upcast logits / exp / log_sm / coeff slabs
    # (~4 x C) plus the upcast features.
    tmp_row = (4 * pC + pD) * 4
    per_row = 2 * in_row + tmp_row                    # double-buffered inputs + temps
    bt = (budget // per_row) // 8 * 8
    # Bytes-driven; cap only to keep a few grid steps for pipelining/megacore.
    return int(max(8, min(bt, 16 * 1024)))


def _objectosphere_kernel(logits_ref, feat_ref, side_ref, out_ref,
                          *, xi, lambda_scale, inv_known):
    logits = logits_ref[...].astype(jnp.float32)      # (bt, C)
    feats = feat_ref[...].astype(jnp.float32)         # (bt, D)
    side = side_ref[...]                              # (bt, 8) f32 packed slab

    w_known = side[:, 0:1]                            # weights[y] * (1 - is_unknown)
    w_unk = side[:, 1:2]                              # weights[y] * is_unknown
    y = side[:, 2:3].astype(jnp.int32)                # true class index

    bt, C = logits.shape

    # log-softmax: one exp pass over (bt, C), one (bt, 1) log.
    m = jnp.max(logits, axis=1, keepdims=True)
    lse = m + jnp.log(jnp.sum(jnp.exp(logits - m), axis=1, keepdims=True))
    # TODO(synk): on v6e/v7x, if the single EUP slot saturates, compute the exp
    # in bfloat16 (not on v5e: no bf16 EUP).
    log_sm = jnp.maximum(logits - lse, _LOG_EPS)      # ~ log(softmax + 1e-10)

    # Fused, pre-weighted cross-entropy term:
    #   known row:   -w_y * log_sm[y]
    #   unknown row: -(w_y / known_num_classes) * sum_c log_sm[c]
    class_ids = jax.lax.broadcasted_iota(jnp.int32, (bt, C), 1)
    onehot = (class_ids == y).astype(jnp.float32)
    coeff = w_known * onehot + w_unk * inv_known      # (bt, C)
    je_w = -jnp.sum(coeff * log_sm, axis=1, keepdims=True)

    # Feature-magnitude penalty (squared norm reused for the unknown branch).
    sq = jnp.sum(feats * feats, axis=1, keepdims=True)
    mag = jnp.sqrt(sq)
    pen_w = w_known * jnp.maximum(xi - mag, 0.0) ** 2 + w_unk * sq

    # Padded tail rows carry w_known == w_unk == 0 -> contribute nothing.
    out_ref[0, 0] = jnp.sum(je_w + lambda_scale * pen_w)


def objectosphere_loss(logits, true_y, is_unknown, deep_features, weights,
                       *, xi, lambda_scale, known_num_classes, b_tile=None):
    B, C = logits.shape
    D = deep_features.shape[1]

    weights = jnp.asarray(weights, jnp.float32)
    y_i32 = true_y.astype(jnp.int32)
    unk_f = is_unknown.astype(jnp.float32)
    w_y = jnp.take(weights, y_i32).astype(jnp.float32)            # (B,)
    denom = jnp.sum(w_y)   # NaN if all weights are zero, same as the reference

    # Pack per-sample side data into one slab (single DMA, one lane-padded
    # VMEM block).  y stored as f32 (exact for class counts < 2^24).
    side = jnp.zeros((B, 8), jnp.float32)
    side = side.at[:, 0].set(w_y * (1.0 - unk_f))
    side = side.at[:, 1].set(w_y * unk_f)
    side = side.at[:, 2].set(y_i32.astype(jnp.float32))

    budget, vmem_limit = _vmem_budget_and_limit()
    if b_tile is None:
        b_tile = _pick_b_tile(C, D, logits.dtype.itemsize,
                              deep_features.dtype.itemsize, budget)
    b_tile = min(int(b_tile), _round_up(B, 8))
    b_tile = max(8, (b_tile // 8) * 8)

    Bp = _round_up(B, b_tile)
    pad = Bp - B
    if pad:
        # Padded rows get zero weights (jnp.pad default) -> no contribution.
        logits_p = jnp.pad(logits, ((0, pad), (0, 0)))
        feats_p = jnp.pad(deep_features, ((0, pad), (0, 0)))
        side_p = jnp.pad(side, ((0, pad), (0, 0)))
    else:
        logits_p, feats_p, side_p = logits, deep_features, side

    num_tiles = Bp // b_tile

    kernel = functools.partial(
        _objectosphere_kernel,
        xi=float(xi),
        lambda_scale=float(lambda_scale),
        inv_known=1.0 / float(known_num_classes),
    )

    row_hbm_bytes = (C * logits.dtype.itemsize
                     + D * deep_features.dtype.itemsize
                     + 8 * 4)
    cost = pl.CostEstimate(
        flops=int(Bp * (7 * C + 2 * D + 16)),
        transcendentals=int(Bp * (C + 2)),               # exp/class + log + sqrt per row
        bytes_accessed=int(Bp * row_hbm_bytes + num_tiles * 4),
    )

    partials = pl.pallas_call(
        kernel,
        out_shape=jax.ShapeDtypeStruct((num_tiles, 1), jnp.float32),
        grid_spec=pltpu.PrefetchScalarGridSpec(
            num_scalar_prefetch=0,
            grid=(num_tiles,),
            in_specs=[
                pl.BlockSpec((b_tile, C), lambda i: (i, 0)),
                pl.BlockSpec((b_tile, D), lambda i: (i, 0)),
                pl.BlockSpec((b_tile, 8), lambda i: (i, 0)),
            ],
            out_specs=pl.BlockSpec((1, 1), lambda i: (i, 0),
                                   memory_space=pltpu.MemorySpace.SMEM),
        ),
        compiler_params=pltpu.CompilerParams(
            # Independent per-tile partial sums: megacore can shard tiles
            # across both TensorCores on v7x.
            dimension_semantics=("parallel",),
            vmem_limit_bytes=vmem_limit,
        ),
        cost_estimate=cost,
    )(logits_p, feats_p, side_p)

    # TODO(synk): if DMA is still exposed at large B, add
    # pipeline_mode=pl.Buffered(3) on the logits/features BlockSpecs.
    return jnp.sum(partials) / denom


def _reference_loss(logits, true_y, is_unknown, deep_features, weights,
                    xi, lambda_scale, known_num_classes):
    # Pure-JAX mirror of the PyTorch forward (correctness check only).
    sm = jax.nn.softmax(logits.astype(jnp.float32), axis=1)
    mag = jnp.linalg.norm(deep_features.astype(jnp.float32), axis=1)
    log_sm = jnp.log(sm + 1e-10)
    je_known = -log_sm[jnp.arange(logits.shape[0]), true_y]
    je_unknown = -(1.0 / known_num_classes) * jnp.sum(log_sm, axis=1)
    pen_known = jnp.maximum(xi - mag, 0.0) ** 2
    pen_unknown = mag ** 2
    unk = is_unknown.astype(jnp.float32)
    jr = unk * (je_unknown + lambda_scale * pen_unknown) + \
         (1.0 - unk) * (je_known + lambda_scale * pen_known)
    w_y = jnp.asarray(weights, jnp.float32)[true_y]
    return jnp.sum(w_y * jr) / jnp.sum(w_y)


if __name__ == "__main__":
    # Deterministic synthetic config mirroring the module __init__.
    xi = 1.0
    lambda_scale = 0.01
    labels = ["cat", "dog", "bird", "unknown"]
    num_classes = len(labels)                                   # 4
    weights = [1.0, 2.0, 1.5, 0.5]                              # per-class weights
    known_num_classes = sum(l != "unknown" for l in labels)     # 3

    B, C, D = 8, num_classes, 32

    key = jax.random.PRNGKey(0)
    k1, k2, k3 = jax.random.split(key, 3)
    logits = jax.random.normal(k1, (B, C), dtype=jnp.float32)
    deep_features = jax.random.normal(k2, (B, D), dtype=jnp.float32)
    true_y = jax.random.randint(k3, (B,), 0, num_classes, dtype=jnp.int32)
    is_unknown = (true_y == (num_classes - 1))                  # last label is 'unknown'

    loss = objectosphere_loss(
        logits, true_y, is_unknown, deep_features, weights,
        xi=xi, lambda_scale=lambda_scale, known_num_classes=known_num_classes)
    loss = jax.block_until_ready(loss)

    ref = _reference_loss(logits, true_y, is_unknown, deep_features, weights,
                          xi, lambda_scale, known_num_classes)
    assert jnp.allclose(loss, ref, rtol=1e-5, atol=1e-5), (loss, ref)

    print("KERNEL_OK")
</pallas_src>

<mosaic_0001>
module attributes {stable_mosaic.version = 11 : i64} {
  func.func @_objectosphere_kernel(%arg0: i32, %arg1: memref<8x4xf32, #tpu.memory_space<vmem>>, %arg2: memref<8x32xf32, #tpu.memory_space<vmem>>, %arg3: memref<8x8xf32, #tpu.memory_space<vmem>>, %arg4: memref<1x1xf32, #tpu.memory_space<smem>>) attributes {dimension_semantics = [#tpu.dimension_semantics<parallel>], iteration_bounds = array<i64: 1>, scalar_prefetch = 0 : i64, scratch_operands = 0 : i64, tpu.core_type = #tpu.core_type<tc>, window_params = [{transform_indices = @transform_0, window_bounds = array<i64: 8, 4>}, {transform_indices = @transform_1, window_bounds = array<i64: 8, 32>}, {transform_indices = @transform_2, window_bounds = array<i64: 8, 8>}, {transform_indices = @transform_3, window_bounds = array<i64: 1, 1>}]} {
    %c0 = arith.constant 0 : index
    %c0_0 = arith.constant 0 : index
    %0 = vector.load %arg1[%c0, %c0_0] : memref<8x4xf32, #tpu.memory_space<vmem>>, vector<8x4xf32>
    %c0_1 = arith.constant 0 : index
    %c0_2 = arith.constant 0 : index
    %1 = vector.load %arg2[%c0_1, %c0_2] : memref<8x32xf32, #tpu.memory_space<vmem>>, vector<8x32xf32>
    %c0_3 = arith.constant 0 : index
    %c0_4 = arith.constant 0 : index
    %2 = vector.load %arg3[%c0_3, %c0_4] : memref<8x8xf32, #tpu.memory_space<vmem>>, vector<8x8xf32>
    %3 = vector.extract_strided_slice %2 {offsets = [0, 0], sizes = [8, 1], strides = [1, 1]} : vector<8x8xf32> to vector<8x1xf32>
    %4 = vector.extract_strided_slice %2 {offsets = [0, 1], sizes = [8, 1], strides = [1, 1]} : vector<8x8xf32> to vector<8x1xf32>
    %5 = vector.extract_strided_slice %2 {offsets = [0, 2], sizes = [8, 1], strides = [1, 1]} : vector<8x8xf32> to vector<8x1xf32>
    %6 = arith.fptosi %5 : vector<8x1xf32> to vector<8x1xi32>
    %cst = arith.constant dense<0xFF800000> : vector<8xf32>
    %7 = vector.multi_reduction <maximumf>, %0, %cst [1] : vector<8x4xf32> to vector<8xf32>
    %8 = vector.shape_cast %7 : vector<8xf32> to vector<8x1xf32>
    %9 = vector.broadcast %8 : vector<8x1xf32> to vector<8x4xf32>
    %10 = arith.subf %0, %9 : vector<8x4xf32>
    %11 = math.exp %10 : vector<8x4xf32>
    %cst_5 = arith.constant dense<0.000000e+00> : vector<8xf32>
    %12 = vector.multi_reduction <add>, %11, %cst_5 [1] : vector<8x4xf32> to vector<8xf32>
    %13 = vector.shape_cast %12 : vector<8xf32> to vector<8x1xf32>
    %14 = math.log %13 : vector<8x1xf32>
    %15 = arith.addf %8, %14 : vector<8x1xf32>
    %16 = vector.broadcast %15 : vector<8x1xf32> to vector<8x4xf32>
    %17 = arith.subf %0, %16 : vector<8x4xf32>
    %cst_6 = arith.constant -23.0258503 : f32
    %18 = vector.broadcast %cst_6 : f32 to vector<8x4xf32>
    %19 = arith.maximumf %17, %18 : vector<8x4xf32>
    %20 = tpu.iota {dimensions = array<i32: 1>} : vector<8x4xi32>
    %21 = vector.broadcast %6 : vector<8x1xi32> to vector<8x4xi32>
    %22 = arith.cmpi eq, %20, %21 : vector<8x4xi32>
    %23 = arith.extui %22 : vector<8x4xi1> to vector<8x4xi32>
    %24 = arith.sitofp %23 : vector<8x4xi32> to vector<8x4xf32>
    %25 = vector.broadcast %3 : vector<8x1xf32> to vector<8x4xf32>
    %26 = arith.mulf %25, %24 : vector<8x4xf32>
    %cst_7 = arith.constant 0.333333343 : f32
    %27 = vector.broadcast %cst_7 : f32 to vector<8x1xf32>
    %28 = arith.mulf %4, %27 : vector<8x1xf32>
    %29 = vector.broadcast %28 : vector<8x1xf32> to vector<8x4xf32>
    %30 = arith.addf %26, %29 : vector<8x4xf32>
    %31 = arith.mulf %30, %19 : vector<8x4xf32>
    %cst_8 = arith.constant dense<0.000000e+00> : vector<8xf32>
    %32 = vector.multi_reduction <add>, %31, %cst_8 [1] : vector<8x4xf32> to vector<8xf32>
    %33 = vector.shape_cast %32 : vector<8xf32> to vector<8x1xf32>
    %cst_9 = arith.constant 0.000000e+00 : f32
    %34 = vector.broadcast %cst_9 : f32 to vector<8x1xf32>
    %35 = arith.subf %34, %33 : vector<8x1xf32>
    %36 = arith.mulf %1, %1 : vector<8x32xf32>
    %cst_10 = arith.constant dense<0.000000e+00> : vector<8xf32>
    %37 = vector.multi_reduction <add>, %36, %cst_10 [1] : vector<8x32xf32> to vector<8xf32>
    %38 = vector.shape_cast %37 : vector<8xf32> to vector<8x1xf32>
    %39 = math.sqrt %38 : vector<8x1xf32>
    %cst_11 = arith.constant 1.000000e+00 : f32
    %40 = vector.broadcast %cst_11 : f32 to vector<8x1xf32>
    %41 = arith.subf %40, %39 : vector<8x1xf32>
    %cst_12 = arith.constant 0.000000e+00 : f32
    %42 = vector.broadcast %cst_12 : f32 to vector<8x1xf32>
    %43 = arith.maximumf %41, %42 : vector<8x1xf32>
    %44 = arith.mulf %43, %43 : vector<8x1xf32>
    %45 = arith.mulf %3, %44 : vector<8x1xf32>
    %46 = arith.mulf %4, %38 : vector<8x1xf32>
    %47 = arith.addf %45, %46 : vector<8x1xf32>
    %cst_13 = arith.constant 0.00999999977 : f32
    %48 = vector.broadcast %cst_13 : f32 to vector<8x1xf32>
    %49 = arith.mulf %48, %47 : vector<8x1xf32>
    %50 = arith.addf %35, %49 : vector<8x1xf32>
    %51 = vector.shape_cast %50 : vector<8x1xf32> to vector<1x8x1xf32>
    %cst_14 = arith.constant dense<0.000000e+00> : vector<1xf32>
    %52 = vector.multi_reduction <add>, %51, %cst_14 [1, 2] : vector<1x8x1xf32> to vector<1xf32>
    %53 = vector.shape_cast %52 : vector<1xf32> to vector<1x1x1xf32>
    %54 = vector.extract %53[0, 0, 0] : f32 from vector<1x1x1xf32>
    %c0_15 = arith.constant 0 : index
    %c0_16 = arith.constant 0 : index
    %55 = memref.load %arg4[%c0_15, %c0_16] : memref<1x1xf32, #tpu.memory_space<smem>>
    memref.store %54, %arg4[%c0_15, %c0_16] : memref<1x1xf32, #tpu.memory_space<smem>>
    return
  }
  func.func @transform_0(%arg0: i32) -> (i32, i32) {
    %c0_i32 = arith.constant 0 : i32
    %c0_i32_0 = arith.constant 0 : i32
    return %arg0, %c0_i32 : i32, i32
  }
  func.func @transform_1(%arg0: i32) -> (i32, i32) {
    %c0_i32 = arith.constant 0 : i32
    %c0_i32_0 = arith.constant 0 : i32
    return %arg0, %c0_i32 : i32, i32
  }
  func.func @transform_2(%arg0: i32) -> (i32, i32) {
    %c0_i32 = arith.constant 0 : i32
    %c0_i32_0 = arith.constant 0 : i32
    return %arg0, %c0_i32 : i32, i32
  }
  func.func @transform_3(%arg0: i32) -> (i32, i32) {
    %c0_i32 = arith.constant 0 : i32
    %c0_i32_0 = arith.constant 0 : i32
    return %arg0, %c0_i32 : i32, i32
  }
}

</mosaic_0001>

<bundles_post_ra>
// kernel: tpu_custom_call.1
= control target key start
LH: loop header
LB: loop body
LE: loop exit
PB: predicated region body
PF: predicated region fallthrough
CT: control target
= control target key end

     0   :  { %8 = vsyncpa [#allocation3], 0  ;;  %s332_s0 = inlined_call_operand.hbm [shape: f32[8,4], index: 0, kind: input, shape index: {}]   ;;  %s333_s1 = inlined_call_operand.hbm [shape: f32[8,32], index: 1, kind: input, shape index: {}]   ;;  %s334_s2 = inlined_call_operand.hbm [shape: f32[8,8], index: 2, kind: input, shape index: {}]   ;;  %s335_s3 = inlined_call_operand.hbm [shape: f32[1,1], index: 3, kind: output, shape index: {}]  }
   0x1   :  { %9 = vsyncpa [#allocation6], 0 }
   0x2   :  { %10 = vsyncpa [#allocation4], 0  ;;  %s252_s12 = smov [#allocation5]   ;;  %s253_s14 = smov [#allocation2]  }
   0x3   :  { %s27_s13 = sshll.u32 %s252_s12, 4  ;;  %s17_s15 = sshll.u32 %s253_s14, 4  ;;  %s28_s13 = int_to_ptr.vmem [resolvable:$true] %s27_s13  ;;  %s18_s15 = int_to_ptr.vmem [resolvable:$true] %s17_s15 }
   0x4   :  { %s170_s18 = scalar_lea.hbm %s333_s1, 128 }
   0x5   :  { %p171_p0 = scmp.ne.s32.totalorder %s333_s1, %s170_s18  ;;  %p174_p1 = scmp.lt.u32.totalorder %s170_s18, %s333_s1 }
   0x7   :  { %p176_p2 = pnand %p174_p1, %p171_p0 }
   0x9   :  { %179 = shalt.err (!%p176_p2)
}
   0xa   :  { %s180_s23 = scalar_lea.vmem %s28_s13, 128  ;;  %p185_p4 = scmp.lt.s32.totalorder %s28_s13, %s28_s13 }
   0xb   :  { %p181_p3 = scmp.ne.s32.totalorder %s28_s13, %s180_s23  ;;  %p186_p5 = scmp.lt.s32.totalorder %s180_s23, %s180_s23 }
   0xd   :  { %p187_p6 = por %p186_p5, %p185_p4 }
   0xf   :  { %p188_p7 = pnand %p187_p6, %p181_p3 }
  0x11   :  { %191 = shalt.err (!%p188_p7)
}
  0x12   :  { %30 = dma.hbm_to_vmem [thread:$0]  %s333_s1, 128, %s28_s13, [#allocation6]  }
  0x13   :  { %s192_s28 = scalar_lea.hbm %s332_s0, 128 }
  0x14   :  { %p193_p8 = scmp.ne.s32.totalorder %s332_s0, %s192_s28  ;;  %p196_p9 = scmp.lt.u32.totalorder %s192_s28, %s332_s0 }
  0x16   :  { %p198_p10 = pnand %p196_p9, %p193_p8 }
  0x18   :  { %201 = shalt.err (!%p198_p10)
}
  0x19   :  { %s202_s6 = scalar_lea.vmem %s18_s15, 128  ;;  %p207_p12 = scmp.lt.s32.totalorder %s18_s15, %s18_s15 }
  0x1a   :  { %p203_p11 = scmp.ne.s32.totalorder %s18_s15, %s202_s6  ;;  %p208_p13 = scmp.lt.s32.totalorder %s202_s6, %s202_s6 }
  0x1c   :  { %p209_p0 = por %p208_p13, %p207_p12 }
  0x1e   :  { %p210_p1 = pnand %p209_p0, %p203_p11 }
  0x20   :  { %213 = shalt.err (!%p210_p1)
}
  0x21   :  { %20 = dma.hbm_to_vmem [thread:$0]  %s332_s0, 128, %s18_s15, [#allocation3]  }
  0x22   :  { %s254_s8 = smov [#allocation7]   ;;  %s214_s12 = scalar_lea.hbm %s334_s2, 128 }
  0x23   :  { %s37_s9 = sshll.u32 %s254_s8, 4  ;;  %p215_p2 = scmp.ne.s32.totalorder %s334_s2, %s214_s12  ;;  %s38_s9 = int_to_ptr.vmem [resolvable:$true] %s37_s9 }
  0x24   :  { %p218_p3 = scmp.lt.u32.totalorder %s214_s12, %s334_s2 }
  0x26   :  { %p220_p4 = pnand %p218_p3, %p215_p2 }
  0x28   :  { %223 = shalt.err (!%p220_p4)
}
  0x29   :  { %s224_s18 = scalar_lea.vmem %s38_s9, 128  ;;  %p229_p6 = scmp.lt.s32.totalorder %s38_s9, %s38_s9 }
  0x2a   :  { %p225_p5 = scmp.ne.s32.totalorder %s38_s9, %s224_s18  ;;  %p230_p7 = scmp.lt.s32.totalorder %s224_s18, %s224_s18 }
  0x2c   :  { %p231_p8 = por %p230_p7, %p229_p6 }
  0x2e   :  { %p232_p9 = pnand %p231_p8, %p225_p5 }
  0x30   :  { %235 = shalt.err (!%p232_p9)
}
  0x31   :  { %40 = dma.hbm_to_vmem [thread:$0]  %s334_s2, 128, %s38_s9, [#allocation6]  }
  0x32   :  { %246 = dma.done.wait [#allocation3], 128  }
  0x33   :  { %247 = vsyncadd [#allocation3], 4294967168 }
  0x34   :  { %248 = dma.done.wait [#allocation6], 256  }
  0x35   :  { %249 = vsyncadd [#allocation6], 4294967040  ;;  %vm54_vm0 = vcmask 31744   ;;  %v50_v0 = vld [vmem:[#allocation2] sm:$0xff]  ;;  %v52_v2 = vld [vmem:[#allocation7] sm:$0xff]  ;;  %v255_v3 = vmov 0   ;;  %v69_v19 = vlaneseq }
  0x36   :  { %v55_v1 = vsel %vm54_vm0, %v50_v0, -inf  ;;  %161 = vset.pattern.permute.xlu1 %v255_v3  ;;  %v148_v4 = vtrunc.f32 %v52_v2  ;;  %v256_v6 = vmov 2   ;;  %v257_v7 = vmov 1   ;;  %v51_v8 = vld [vmem:[#allocation5] sm:$0xff]  ;;  %s259_s2 = smov 127   ;;  %s236_s22 = scalar_lea.hbm %s335_s3, 16 }
  0x37   :  { %56 = vmax.xlane.f32.xlu0 %v55_v1  ;;  %79 = vperm.xlu1 %161, %v52_v2   ;;  %v95_v9 = vmul.f32 %v51_v8, %v51_v8  ;;  %vm96_vm1 = vcmask 261120   ;;  %v83_v16 = vmul.f32 0.33333334, %v52_v2  ;;  %v70_v20 = vand.u32 127, %v69_v19  ;;  %p237_p10 = scmp.ne.s32.totalorder %s335_s3, %s236_s22  ;;  %p240_p11 = scmp.lt.u32.totalorder %s236_s22, %s335_s3 }
  0x38   :  { %v149_v5 = vcvt.f32.s32 %v148_v4  ;;  %163 = vset.pattern.permute.xlu0 %v257_v7  ;;  %v258_v24 = vmov 0.0   ;;  %vm119_vm5 = vcmask 7168  }
  0x39   :  { %v97_v10 = vsel %vm96_vm1, %v95_v9, 0.0  ;;  %p242_p12 = pnand %p240_p11, %p237_p10 }
  0x3b   :  { %162 = vset.pattern.permute.xlu1 %v256_v6 }
  0x3c   :  { %72 = vperm.xlu1 %162, %v149_v5  }
  0x60   :  { %98 = vadd.xlane.f32.xlu1 %v97_v10 }
  0xb6   :  { %v80_v18 = vpop.permute.xlu1 %79 }
  0xbb   :  { %v73_v21 = vpop.permute.xlu1 %72 }
  0xbc   :  { %vm74_vm2 = vcmp.eq.s32.totalorder %v70_v20, %v73_v21 }
  0xbd   :  { %v147_v25 = vsel %vm74_vm2, 1.0, %v258_v24 }
  0xbe   :  { %v82_v28 = vmul.f32 %v147_v25, %v80_v18 }
  0xc4   :  { %v57_v11 = vpop.xlane.xlu0 %56 }
  0xc5   :  { %v58_v12 = vsub.f32 %v50_v0, %v57_v11 }
  0xc7   :  { %v59_v13 = vmul.f32 1.442695, %v58_v12 }
  0xc9   :  { %164 = vpow2.f32 %v59_v13 }
  0xd3   :  { %v165_v14 = vpop.eup %164 }
  0xd4   :  { %v61_v15 = vsel %vm54_vm0, %v165_v14, 0.0 }
  0xd5   :  { %62 = vadd.xlane.f32.xlu0 %v61_v15 }
  0xeb   :  { %86 = vperm.xlu0 %163, %v83_v16  }
  0xed   :  { %v99_v34 = vpop.xlane.xlu1 %98 }
  0xee   :  { %v111_v35 = vmul.f32 %v99_v34, %v52_v2  ;;  %vm102_vm3 = vcmp.eq.f32.partialorder %v99_v34, inf  ;;  %v105_v38 = vand.u32 2147483648, %v99_v34  ;;  %vm104_vm4 = vcmp.eq.f32.partialorder %v99_v34, 0.0 }
 0x162   :  { %v63_v17 = vpop.xlane.xlu0 %62 }
 0x163   :  { %166 = vlog2.f32 %v63_v17 }
 0x164   :  { %168 = vrsqrt.f32 %v99_v34 }
 0x16a   :  { %v87_v27 = vpop.permute.xlu0 %86 }
 0x16b   :  { %v89_v30 = vadd.f32 %v87_v27, %v82_v28 }
 0x16d   :  { %v167_v22 = vpop.eup %166 }
 0x16e   :  { %v65_v23 = vmul.f32 0.6931472, %v167_v22  ;;  %v169_v36 = vpop.eup %168 }
 0x16f   :  { %v101_v37 = vmul.f32 %v169_v36, %v99_v34 }
 0x170   :  { %v66_v26 = vadd.f32 %v65_v23, %v57_v11 }
 0x171   :  { %v103_v39 = vsel %vm102_vm3, %v99_v34, %v101_v37 }
 0x172   :  { %v67_v29 = vsub.f32 %v50_v0, %v66_v26  ;;  %v106_v40 = vsel %vm104_vm4, %v105_v38, %v103_v39 }
 0x173   :  { %v107_v41 = vsub.f32 1.0, %v106_v40 }
 0x174   :  { %v68_v31 = vmax.f32 %v67_v29, -23.02585 }
 0x175   :  { %v108_v42 = vmax.f32 %v107_v41, 0.0 }
 0x176   :  { %v90_v32 = vmul.f32 %v89_v30, %v68_v31 }
 0x177   :  { %v109_v43 = vmul.f32 %v108_v42, %v108_v42 }
 0x178   :  { %v91_v33 = vsel %vm54_vm0, %v90_v32, 0.0 }
 0x179   :  { %92 = vadd.xlane.f32.xlu1 %v91_v33  ;;  %v110_v45 = vmul.f32 %v109_v43, %v52_v2 }
 0x18a   :  { %113 = vrot.lane.b32.xlu1 %v111_v35, %s259_s2 }
 0x206   :  { %v93_v44 = vpop.xlane.xlu1 %92 }
 0x207   :  { %v94_v48 = vsub.f32 0.0, %v93_v44 }
 0x20a   :  { %v114_v46 = vpop.permute.xlu1 %113 }
 0x20b   :  { %v116_v47 = vadd.f32 %v114_v46, %v110_v45 }
 0x20d   :  { %v117_v49 = vmul.f32 0.01, %v116_v47 }
 0x20f   :  { %v118_v50 = vadd.f32 %v117_v49, %v94_v48 }
 0x211   :  { %v120_v51 = vsel %vm119_vm5, %v118_v50, 0.0 }
 0x212   :  { %121 = vadd.xlane.f32.xlu0 %v120_v51 }
 0x29f   :  { %v122_v52 = vpop.xlane.xlu0 %121 }
 0x2a0   :  { %v123_v53 = vrot.slane %v122_v52, 4 }
 0x2a2   :  { %v124_v54 = vadd.f32 %v123_v53, %v122_v52 }
 0x2a4   :  { %v125_v55 = vrot.slane %v124_v54, 2 }
 0x2a6   :  { %v126_v56 = vadd.f32 %v125_v55, %v124_v54 }
 0x2a8   :  { %v127_v57 = vrot.slane %v126_v56, 1 }
 0x2aa   :  { %v128_v58 = vadd.f32 %v127_v57, %v126_v56 }
 0x2ac   :  { %150 = vpush %v128_v58 }
 0x2dd   :  { %s151_s19 = spop %150 }
 0x2de   :  { %131 = sst [smem:[#allocation8]] %s151_s19 }
 0x2df   :  { %245 = shalt.err (!%p242_p12)
}
 0x2e0   :  { %s260_s27 = smov [#allocation8]  }
 0x2e1   :  { %139 = dma.smem_to_hbm %s260_s27, 16, %s335_s3, [#allocation4]  }
 0x2e2   :  { %250 = dma.done.wait [#allocation4], 16  }
 0x2e3   :  { %251 = vsyncadd [#allocation4], 4294967280 }
 0x2e4   :  { %143 = sfence }
 0x2e5   :  { %144 = vsyncpa [#allocation3], 1 }
 0x2e6   :  { %145 = vsyncpa [#allocation6], 1 }
 0x2e7   :  { %146 = vsyncpa [#allocation4], 1 }

</bundles_post_ra>
